<compile_context>
chip_gen: v7x
topology: tpu7x:2x2x1
jax: 0.10.0
libtpu: 0.0.40
codegen_flags: <defaults>
</compile_context>

<pallas_src>
import jax
import jax.numpy as jnp
from jax.experimental import pallas as pl
from jax.experimental.pallas import tpu as pltpu


def _round_up(x, m):
    return ((x + m - 1) // m) * m


def _round_down(x, m):
    return (x // m) * m


def _seqwise_linear_kernel(x_ref, w_ref, b_ref, o_ref):
    # x_ref : (tm, H_in)    bf16 row tile of the collapsed (T*N, H_in) input
    # w_ref : (H_in, tn)    bf16 (pre-transposed) weight block
    # b_ref : (1, tn)       f32 bias tile
    # o_ref : (tm, tn)      f32 output tile
    acc = jnp.dot(x_ref[...], w_ref[...], preferred_element_type=jnp.float32)
    o_ref[...] = (acc + b_ref[...]).astype(o_ref.dtype)


def _vmem_budget():
    """Returns (tile_budget_bytes, vmem_limit_bytes), per TensorCore."""
    try:
        cap = pltpu.get_tpu_info().vmem_capacity_bytes
    except Exception:
        cap = 64 * 1024 * 1024  # assume the small (v7x per-TC) case if unknown
    if cap >= 100 * 1024 * 1024:
        # v5e / v6e: 128 MiB VMEM, single TC -> big tiles pay off (bandwidth-starved).
        return 56 * 1024 * 1024, 80 * 1024 * 1024
    # v7x: 64 MiB per TC and both TCs hold their own buffers ("parallel" grid axes).
    return 26 * 1024 * 1024, 44 * 1024 * 1024


def _pick_tm(m, h_in, tn, budget_bytes, w_vmem_bytes, requested=None):
    """Row-tile size: MXU-aligned, sized so double-buffered tiles fit the budget."""
    x_item = 2  # bf16
    per_row = 2 * (h_in * x_item + tn * 4)          # dbl-buffered x row + f32 out row
    avail = max(0, budget_bytes - w_vmem_bytes - 2 * tn * 4)
    tm_cap = max(8, avail // per_row)
    tm = min(requested if requested is not None else 1024, tm_cap)
    if tm >= 256:
        tm = _round_down(tm, 256)                    # full 256x256 MXU passes (v6e/v7x)
    else:
        tm = max(8, _round_down(tm, 8))
    # Don't make the tile bigger than the (8-aligned) problem.
    tm = min(tm, max(8, _round_up(m, 8)))
    return tm


def sequence_wise_linear(x, weight, bias, *, tm=None):
    """SequenceWise(nn.Linear): y = x.view(T*N, H_in) @ W^T + b, reshaped to (T, N, H_out).

    x      : (T, N, H_in)  float32 (time-major, as in PyTorch)
    weight : (H_out, H_in) PyTorch nn.Linear layout
    bias   : (H_out,)
    """
    t, n, h_in = x.shape
    h_out = weight.shape[0]
    m = t * n

    budget_bytes, vmem_limit = _vmem_budget()

    # ---- H_out padding / weight residency decision --------------------------------
    h_out_p = _round_up(h_out, 128)                  # lane-dense output stores
    w_bf16_bytes = h_in * h_out_p * 2
    resident = w_bf16_bytes <= 9 * 1024 * 1024       # e.g. 2048x2048 bf16 (8 MiB) fits
    if resident:
        tn = h_out_p
    else:
        tn = 256
        h_out_p = _round_up(h_out, tn)
    w_vmem_bytes = 2 * h_in * tn * 2                 # double-buffered bf16 weight block

    tm = _pick_tm(m, h_in, tn, budget_bytes, w_vmem_bytes, requested=tm)
    grid_i = pl.cdiv(m, tm)                          # last block may be partial (no row pad)

    # ---- Wrapper-side casts / layout (one-off, fused by XLA) ----------------------
    x2d = x.reshape(m, h_in).astype(jnp.bfloat16)                       # (M, H_in) bf16
    w_t = jnp.pad(weight, ((0, h_out_p - h_out), (0, 0))).T.astype(jnp.bfloat16)  # (H_in, H_out_p)
    b2d = jnp.pad(bias, (0, h_out_p - h_out)).astype(jnp.float32).reshape(1, h_out_p)

    # ---- Specs ---------------------------------------------------------------------
    if resident:
        grid = (grid_i,)
        in_specs = [
            pl.BlockSpec((tm, h_in), lambda i: (i, 0)),          # streamed x row tile
            pl.BlockSpec((h_in, h_out_p), lambda i: (0, 0)),     # resident W (DMA'd once)
            pl.BlockSpec((1, h_out_p), lambda i: (0, 0)),        # resident bias
        ]
        out_specs = pl.BlockSpec((tm, h_out_p), lambda i: (i, 0))
        dim_sem = ("parallel",)
    else:
        grid = (grid_i, h_out_p // tn)
        in_specs = [
            pl.BlockSpec((tm, h_in), lambda i, j: (i, 0)),
            pl.BlockSpec((h_in, tn), lambda i, j: (0, j)),
            pl.BlockSpec((1, tn), lambda i, j: (0, j)),
        ]
        out_specs = pl.BlockSpec((tm, tn), lambda i, j: (i, j))
        dim_sem = ("parallel", "parallel")

    w_hbm_bytes = h_in * h_out_p * 2 * (1 if resident else grid_i)  # re-streamed if tiled
    cost = pl.CostEstimate(
        flops=2 * m * h_in * h_out_p,
        transcendentals=0,
        bytes_accessed=int(m * h_in * 2 + w_hbm_bytes + h_out_p * 4 + m * h_out_p * 4),
    )

    out2d = pl.pallas_call(
        _seqwise_linear_kernel,
        out_shape=jax.ShapeDtypeStruct((m, h_out_p), x.dtype),
        grid_spec=pltpu.PrefetchScalarGridSpec(
            num_scalar_prefetch=0,
            grid=grid,
            in_specs=in_specs,
            out_specs=out_specs,
        ),
        compiler_params=pltpu.CompilerParams(
            dimension_semantics=dim_sem,
            vmem_limit_bytes=vmem_limit,
        ),
        cost_estimate=cost,
    )(x2d, w_t, b2d)

    return out2d[:, :h_out].reshape(t, n, h_out)


if __name__ == "__main__":
    # Small shapes consistent with the forward: (T, N, H)
    T, N, H_IN, H_OUT = 8, 2, 32, 32

    key = jax.random.PRNGKey(0)
    kx, kw, kb = jax.random.split(key, 3)

    x = jax.random.normal(kx, (T, N, H_IN), dtype=jnp.float32)
    weight = jax.random.normal(kw, (H_OUT, H_IN), dtype=jnp.float32) * 0.1
    bias = jax.random.normal(kb, (H_OUT,), dtype=jnp.float32) * 0.1

    y = jax.block_until_ready(sequence_wise_linear(x, weight, bias))

    # Reference (pure JAX, same semantics as SequenceWise(nn.Linear)); tolerance is
    # loosened because the kernel feeds the MXU bf16 (f32 accumulation).
    ref = (x.reshape(T * N, H_IN) @ weight.T + bias).reshape(T, N, H_OUT)
    assert y.shape == (T, N, H_OUT)
    assert jnp.allclose(y, ref, atol=5e-2, rtol=5e-2)

    # Exercise the partial-last-block path (m % tm != 0) and H_out < 128 lane padding.
    T2, N2, H_IN2, H_OUT2 = 25, 3, 48, 29
    k2x, k2w, k2b = jax.random.split(jax.random.PRNGKey(0), 3)
    x2 = jax.random.normal(k2x, (T2, N2, H_IN2), dtype=jnp.float32)
    w2 = jax.random.normal(k2w, (H_OUT2, H_IN2), dtype=jnp.float32) * 0.1
    b2 = jax.random.normal(k2b, (H_OUT2,), dtype=jnp.float32) * 0.1
    y2 = jax.block_until_ready(sequence_wise_linear(x2, w2, b2, tm=32))
    ref2 = (x2.reshape(T2 * N2, H_IN2) @ w2.T + b2).reshape(T2, N2, H_OUT2)
    assert y2.shape == (T2, N2, H_OUT2)
    assert jnp.allclose(y2, ref2, atol=5e-2, rtol=5e-2)

    print("KERNEL_OK")
</pallas_src>

<mosaic_0001>
module attributes {stable_mosaic.version = 11 : i64} {
  func.func @_seqwise_linear_kernel(%arg0: i32, %arg1: memref<16x32xbf16, #tpu.memory_space<vmem>>, %arg2: memref<32x128xbf16, #tpu.memory_space<vmem>>, %arg3: memref<1x128xf32, #tpu.memory_space<vmem>>, %arg4: memref<16x128xf32, #tpu.memory_space<vmem>>) attributes {dimension_semantics = [#tpu.dimension_semantics<parallel>], iteration_bounds = array<i64: 1>, scalar_prefetch = 0 : i64, scratch_operands = 0 : i64, tpu.core_type = #tpu.core_type<tc>, window_params = [{transform_indices = @transform_0, window_bounds = array<i64: 16, 32>}, {pipeline_mode = #tpu.pipeline_mode<synchronous>, transform_indices = @transform_1, window_bounds = array<i64: 32, 128>}, {pipeline_mode = #tpu.pipeline_mode<synchronous>, transform_indices = @transform_2, window_bounds = array<i64: 1, 128>}, {transform_indices = @transform_3, window_bounds = array<i64: 16, 128>}]} {
    %c0 = arith.constant 0 : index
    %c0_0 = arith.constant 0 : index
    %0 = vector.load %arg1[%c0, %c0_0] : memref<16x32xbf16, #tpu.memory_space<vmem>>, vector<16x32xbf16>
    %c0_1 = arith.constant 0 : index
    %c0_2 = arith.constant 0 : index
    %1 = vector.load %arg2[%c0_1, %c0_2] : memref<32x128xbf16, #tpu.memory_space<vmem>>, vector<32x128xbf16>
    %cst = arith.constant dense<0.000000e+00> : vector<16x128xf32>
    %2 = tpu.matmul %0, %1, %cst {dimension_numbers = #tpu.dot_dimension_numbers<[1], [0], [0], [1], [0, 0, 1, 1], [], []>} : vector<16x32xbf16>, vector<32x128xbf16>, vector<16x128xf32> -> vector<16x128xf32>
    %c0_3 = arith.constant 0 : index
    %c0_4 = arith.constant 0 : index
    %3 = vector.load %arg3[%c0_3, %c0_4] : memref<1x128xf32, #tpu.memory_space<vmem>>, vector<1x128xf32>
    %4 = vector.broadcast %3 : vector<1x128xf32> to vector<16x128xf32>
    %5 = arith.addf %2, %4 : vector<16x128xf32>
    %c0_5 = arith.constant 0 : index
    %c0_6 = arith.constant 0 : index
    %6 = vector.load %arg4[%c0_5, %c0_6] : memref<16x128xf32, #tpu.memory_space<vmem>>, vector<16x128xf32>
    tpu.vector_store %arg4[%c0_5, %c0_6], %5 {strides = array<i32>} : memref<16x128xf32, #tpu.memory_space<vmem>>, vector<16x128xf32>,
    return
  }
  func.func @transform_0(%arg0: i32) -> (i32, i32) {
    %c0_i32 = arith.constant 0 : i32
    %c0_i32_0 = arith.constant 0 : i32
    return %arg0, %c0_i32 : i32, i32
  }
  func.func @transform_1(%arg0: i32) -> (i32, i32) {
    %c0_i32 = arith.constant 0 : i32
    %c0_i32_0 = arith.constant 0 : i32
    %c0_i32_1 = arith.constant 0 : i32
    return %c0_i32, %c0_i32_0 : i32, i32
  }
  func.func @transform_2(%arg0: i32) -> (i32, i32) {
    %c0_i32 = arith.constant 0 : i32
    %c0_i32_0 = arith.constant 0 : i32
    %c0_i32_1 = arith.constant 0 : i32
    return %c0_i32, %c0_i32_0 : i32, i32
  }
  func.func @transform_3(%arg0: i32) -> (i32, i32) {
    %c0_i32 = arith.constant 0 : i32
    %c0_i32_0 = arith.constant 0 : i32
    return %arg0, %c0_i32 : i32, i32
  }
}

</mosaic_0001>

<bundles_post_ra>
// kernel: tpu_custom_call.1
= control target key start
LH: loop header
LB: loop body
LE: loop exit
PB: predicated region body
PF: predicated region fallthrough
CT: control target
= control target key end

     0   :  { %8 = vsyncpa [#allocation3], 0  ;;  %s307_s0 = inlined_call_operand.hbm [shape: bf16[16,32], index: 0, kind: input, shape index: {}]   ;;  %s308_s1 = inlined_call_operand.hbm [shape: bf16[32,128], index: 1, kind: input, shape index: {}]   ;;  %s309_s2 = inlined_call_operand.vmem [shape: f32[1,128], index: 2, kind: input, shape index: {}]   ;;  %s310_s3 = inlined_call_operand.hbm [shape: f32[16,128], index: 3, kind: output, shape index: {}]  }
   0x1   :  { %9 = vsyncpa [#allocation6], 0 }
   0x2   :  { %10 = vsyncpa [#allocation4], 0  ;;  %s239_s12 = smov [#allocation2]   ;;  %s167_s16 = scalar_lea.hbm %s307_s0, 128 }
   0x3   :  { %s16_s13 = sshll.u32 %s239_s12, 4  ;;  %p168_p0 = scmp.ne.s32.totalorder %s307_s0, %s167_s16  ;;  %s17_s13 = int_to_ptr.vmem [resolvable:$true] %s16_s13 }
   0x4   :  { %p171_p1 = scmp.lt.u32.totalorder %s167_s16, %s307_s0 }
   0x6   :  { %p173_p2 = pnand %p171_p1, %p168_p0 }
   0x8   :  { %176 = shalt.err (!%p173_p2)
}
   0x9   :  { %s177_s21 = scalar_lea.vmem %s17_s13, 128  ;;  %p182_p4 = scmp.lt.s32.totalorder %s17_s13, %s17_s13 }
   0xa   :  { %p178_p3 = scmp.ne.s32.totalorder %s17_s13, %s177_s21  ;;  %p183_p5 = scmp.lt.s32.totalorder %s177_s21, %s177_s21 }
   0xc   :  { %p184_p6 = por %p183_p5, %p182_p4 }
   0xe   :  { %p185_p7 = pnand %p184_p6, %p178_p3 }
  0x10   :  { %188 = shalt.err (!%p185_p7)
}
  0x11   :  { %s240_s22 = smov 64   ;;  %s241_s23 = smov 4  }
  0x12   :  { %22 = dma.hbm_to_vmem [thread:$0]  %s307_s0, 128, %s17_s13, [#allocation3], %s240_s22, %s240_s22, %s241_s23  }
  0x13   :  { %s242_s26 = smov [#allocation5]   ;;  %s189_s30 = scalar_lea.hbm %s308_s1, 256 }
  0x14   :  { %s28_s27 = sshll.u32 %s242_s26, 4  ;;  %p190_p8 = scmp.ne.s32.totalorder %s308_s1, %s189_s30  ;;  %s29_s27 = int_to_ptr.vmem [resolvable:$true] %s28_s27 }
  0x15   :  { %p193_p9 = scmp.lt.u32.totalorder %s189_s30, %s308_s1 }
  0x17   :  { %p195_p10 = pnand %p193_p9, %p190_p8 }
  0x19   :  { %198 = shalt.err (!%p195_p10)
}
  0x1a   :  { %s199_s8 = scalar_lea.vmem %s29_s27, 256  ;;  %p204_p12 = scmp.lt.s32.totalorder %s29_s27, %s29_s27 }
  0x1b   :  { %p200_p11 = scmp.ne.s32.totalorder %s29_s27, %s199_s8  ;;  %p205_p13 = scmp.lt.s32.totalorder %s199_s8, %s199_s8 }
  0x1d   :  { %p206_p0 = por %p205_p13, %p204_p12 }
  0x1f   :  { %p207_p1 = pnand %p206_p0, %p200_p11 }
  0x21   :  { %210 = shalt.err (!%p207_p1)
}
  0x22   :  { %34 = dma.hbm_to_vmem [thread:$0]  %s308_s1, 256, %s29_s27, [#allocation6], %s240_s22, %s240_s22, %s241_s23  }
  0x23   :  { %233 = dma.done.wait [#allocation3], 128  }
  0x24   :  { %234 = vsyncadd [#allocation3], 4294967168 }
  0x25   :  { %235 = dma.done.wait [#allocation6], 256  }
  0x26   :  { %236 = vsyncadd [#allocation6], 4294967040  ;;  %v243_v0 = vmov 0.0   ;;  %vm244_vm0 = vmmov 0   ;;  %v164_v1 = vld [vmem:[#allocation5] sm:$0xff]   ;;  %v165_v2 = vld [vmem:[#allocation5 + $0x8] sm:$0xff]  }
  0x27   :  { %147 = vmatprep.subr.bf16.mxu0 %v243_v0  ;;  %151 = vmatprep.mubr.msk.bf16.mxu0 %vm244_vm0, %v243_v0  ;;  %v166_v3 = vld [vmem:[#allocation2] sm:$0xff]   ;;  %vm74_vm1 = vcmask 261120   ;;  %s245_s1 = smov [#allocation7]  }
  0x28   :  { %148 = vmatpush3.bf16.msra.mxu0 %v164_v1  ;;  %v139_v4 = vld [vmem:[%s309_s2] ss:$0 sm:$0xff]  ;;  %s126_s12 = sshll.u32 %s245_s1, 4  ;;  %s127_s12 = int_to_ptr.vmem [resolvable:$true] %s126_s12 }
  0x29   :  { %149 = vmatprep.subr.bf16.mxu0 %v243_v0  ;;  %s211_s13 = scalar_lea.vmem %s127_s12, 256  ;;  %p216_p3 = scmp.lt.s32.totalorder %s127_s12, %s127_s12 }
  0x2a   :  { %p212_p2 = scmp.ne.s32.totalorder %s127_s12, %s211_s13  ;;  %p217_p4 = scmp.lt.s32.totalorder %s211_s13, %s211_s13 }
  0x2c   :  { %150 = vmatpush3.bf16.msra.mxu0 %v165_v2  ;;  %p218_p5 = por %p217_p4, %p216_p3 }
  0x2e   :  { %p219_p6 = pnand %p218_p5, %p212_p2 }
  0x2f   :  { %152 = vmatmul.mubr.msk.bf16.vlgmr.msra.gmra.mrb[0].mxu0 %vm74_vm1, %v166_v3 }
 0x102   :  { %v112_v5 = vpop.f32.mrb[0].mxu0 }
 0x103   :  { %v113_v6 = vadd.f32 %v139_v4, %v112_v5  ;;  %v153_v7 = vpop.f32.mrb[1].mxu0 }
 0x104   :  { %v115_v8 = vpop.f32.mrb[2].mxu0 }
 0x105   :  { %119 = vst [vmem:[#allocation7] sm:$0xff] %v113_v6  ;;  %v116_v9 = vadd.f32 %v139_v4, %v115_v8  ;;  %v154_v10 = vpop.f32.mrb[3].mxu0 }
 0x107   :  { %120 = vst [vmem:[#allocation7 + $0x8] sm:$0xff] %v116_v9 }
 0x108   :  { %222 = shalt.err (!%p219_p6)
}
 0x109   :  { %s223_s15 = scalar_lea.hbm %s310_s3, 256 }
 0x10a   :  { %p224_p7 = scmp.ne.s32.totalorder %s310_s3, %s223_s15  ;;  %p227_p8 = scmp.lt.u32.totalorder %s223_s15, %s310_s3 }
 0x10c   :  { %p229_p9 = pnand %p227_p8, %p224_p7 }
 0x10e   :  { %232 = shalt.err (!%p229_p9)
}
 0x10f   :  { %s246_s20 = smov 128   ;;  %s247_s21 = smov 8  }
 0x110   :  { %132 = dma.vmem_to_hbm [thread:$0]  %s127_s12, 256, %s310_s3, [#allocation4], %s246_s20, %s246_s20, %s247_s21  }
 0x111   :  { %237 = dma.done.wait [#allocation4], 256  }
 0x112   :  { %238 = vsyncadd [#allocation4], 4294967040 }
 0x113   :  { %136 = vsyncpa [#allocation3], 1 }
 0x114   :  { %137 = vsyncpa [#allocation6], 1 }
 0x115   :  { %138 = vsyncpa [#allocation4], 1 }

</bundles_post_ra>
